<compile_context>
chip_gen: v7x
topology: tpu7x:2x2x1
jax: 0.10.0
libtpu: 0.0.40
codegen_flags: <defaults>
</compile_context>

<pallas_src>
import functools

import numpy as np
import jax
import jax.numpy as jnp
from jax import lax
from jax.experimental import pallas as pl
from jax.experimental.pallas import tpu as pltpu


# ----------------------------- JPEG constants ------------------------------

_LUMA_Q = np.array(
    [[16, 11, 10, 16, 24, 40, 51, 61],
     [12, 12, 14, 19, 26, 58, 60, 55],
     [14, 13, 16, 24, 40, 57, 69, 56],
     [14, 17, 22, 29, 51, 87, 80, 62],
     [18, 22, 37, 56, 68, 109, 103, 77],
     [24, 35, 55, 64, 81, 104, 113, 92],
     [49, 64, 78, 87, 103, 121, 120, 101],
     [72, 92, 95, 98, 112, 100, 103, 99]], dtype=np.float64)

_CHROMA_Q = np.array(
    [[17, 18, 24, 47, 99, 99, 99, 99],
     [18, 21, 26, 66, 99, 99, 99, 99],
     [24, 26, 56, 99, 99, 99, 99, 99],
     [47, 66, 99, 99, 99, 99, 99, 99],
     [99, 99, 99, 99, 99, 99, 99, 99],
     [99, 99, 99, 99, 99, 99, 99, 99],
     [99, 99, 99, 99, 99, 99, 99, 99],
     [99, 99, 99, 99, 99, 99, 99, 99]], dtype=np.float64)


def _scaled_qtable(base, quality):
    # libjpeg quality scaling.
    quality = int(quality)
    if quality < 50:
        scale = 5000 // quality
    else:
        scale = 200 - 2 * quality
    q = np.floor((base * scale + 50.0) / 100.0)
    return np.clip(q, 1.0, 255.0).astype(np.float32)


def _dct8():
    # Orthonormal 8x8 DCT-II matrix.
    k = np.arange(8, dtype=np.float64)[:, None]
    n = np.arange(8, dtype=np.float64)[None, :]
    d = np.sqrt(2.0 / 8.0) * np.cos((2.0 * n + 1.0) * k * np.pi / 16.0)
    d[0, :] = np.sqrt(1.0 / 8.0)
    return d.astype(np.float32)


def _block_diag_dct(size):
    # Block-diagonal matrix so one tile-sized matmul performs independent
    # 8x8 blockwise DCTs along one axis.  Size is capped at the tile size,
    # never the full image dimension.
    return np.kron(np.eye(size // 8, dtype=np.float32), _dct8())


def _pick_tile(dim, target, quantum):
    # Largest divisor of `dim` that is a multiple of `quantum` and <= target;
    # fall back to the full dim (always legal as a full-extent block).
    best = dim
    for t in range(quantum, min(dim, target) + 1, quantum):
        if dim % t == 0:
            best = t
    return best if dim % best == 0 else dim


# -------------------------------- kernel -----------------------------------

def _jpeg_tile_kernel(x_ref, dh_ref, dw_ref, qt_ref, qr_ref, out_ref, bits_ref):
    th = x_ref.shape[2]
    tw = x_ref.shape[3]

    # compress(): clamp to [0, 1], * 255, truncate to uint8 (floor for >= 0).
    r = jnp.floor(jnp.clip(x_ref[0, 0], 0.0, 1.0) * 255.0)
    g = jnp.floor(jnp.clip(x_ref[0, 1], 0.0, 1.0) * 255.0)
    b = jnp.floor(jnp.clip(x_ref[0, 2], 0.0, 1.0) * 255.0)

    # RGB -> YCbCr, level-shifted by -128 for the DCT.
    y = 0.299 * r + 0.587 * g + 0.114 * b - 128.0
    cb = -0.168736 * r - 0.331264 * g + 0.5 * b
    cr = 0.5 * r - 0.418688 * g - 0.081312 * b

    dh = dh_ref[...]          # (TH, TH) block-diag 8x8 DCT (rows)
    dw = dw_ref[...]          # (TW, TW) block-diag 8x8 DCT (cols)

    # Fold channels into the lane (non-contracted) dim: one MXU matmul with a
    # TH-deep contraction and a 3*TW-wide output instead of three TW-wide ones.
    ycc = jnp.concatenate([y, cb, cr], axis=1)                 # (TH, 3*TW)
    a = jnp.dot(dh, ycc, preferred_element_type=jnp.float32)   # row DCT

    # Re-fold channels into the sublane dim so the column DCT contracts over
    # TW only (keeps block-diag redundancy capped at TW/8).
    a2 = jnp.concatenate([a[:, :tw], a[:, tw:2 * tw], a[:, 2 * tw:]], axis=0)
    coeff = lax.dot_general(a2, dw, (((1,), (1,)), ((), ())),   # a2 @ dw^T
                            preferred_element_type=jnp.float32)  # (3*TH, TW)

    # Quantize with a precomputed reciprocal table (VPU multiply, no divide).
    qcoef = jnp.round(coeff * qr_ref[...])

    # Entropy-size estimate: JPEG magnitude category = floor(log2(|q|)) + 1,
    # computed exactly via float32 exponent extraction (|q| is integer-valued),
    # plus ~4 bits of Huffman prefix per nonzero coefficient.
    mag = jnp.abs(qcoef)
    expo = (pltpu.bitcast(mag, jnp.int32) >> 23) - 126   # sign bit is 0
    cat = expo.astype(jnp.float32)
    bits_ref[0, 0, 0] = jnp.sum(jnp.where(mag > 0.0, cat + 4.0, 0.0))

    # Dequantize + inverse blockwise DCT (transposes expressed via
    # dot_general contraction dims; no transposed DCT copies needed).
    deq = qcoef * qt_ref[...]                                   # (3*TH, TW)
    b1 = jnp.dot(deq, dw, preferred_element_type=jnp.float32)   # col inverse
    b2 = jnp.concatenate([b1[:th], b1[th:2 * th], b1[2 * th:]], axis=1)
    rec = lax.dot_general(dh, b2, (((0,), (0,)), ((), ())),     # dh^T @ b2
                          preferred_element_type=jnp.float32)   # (TH, 3*TW)

    y_r = rec[:, :tw] + 128.0
    cb_r = rec[:, tw:2 * tw]
    cr_r = rec[:, 2 * tw:]

    r_o = y_r + 1.402 * cr_r
    g_o = y_r - 0.344136 * cb_r - 0.714136 * cr_r
    b_o = y_r + 1.772 * cb_r

    # Decoder: round to uint8, then /255 (multiply by reciprocal).
    inv255 = np.float32(1.0 / 255.0)
    out_ref[0, 0] = jnp.clip(jnp.round(r_o), 0.0, 255.0) * inv255
    out_ref[0, 1] = jnp.clip(jnp.round(g_o), 0.0, 255.0) * inv255
    out_ref[0, 2] = jnp.clip(jnp.round(b_o), 0.0, 255.0) * inv255


# ------------------------------- wrapper ------------------------------------

@functools.partial(jax.jit, static_argnames=("quality",))
def turbo_jpeg_compression(x, quality=25):
    """Pallas equivalent of TurboJPEGCompression.forward.

    Returns (decompressed [N, 3, H, W] float32, jpeg_bpp scalar float32).
    """
    n, c, h, w = x.shape
    if c == 1:
        x = jnp.repeat(x, 3, axis=1)          # img_tensor.repeat(3, 1, 1)
    assert x.shape[1] == 3, "JPEG path expects 1 or 3 channels"
    assert h % 8 == 0 and w % 8 == 0, "H, W must be multiples of 8"

    # Tile sizes: sublane tile is any multiple-of-8 divisor <= 128; lane tile
    # is 128 when possible (lane-dense stores), otherwise the full width.
    th = _pick_tile(h, 128, 8)
    tw = _pick_tile(w, 128, 128)
    n_i, n_j = h // th, w // tw

    dh = jnp.asarray(_block_diag_dct(th))
    dw = dh if tw == th else jnp.asarray(_block_diag_dct(tw))

    # Tile-sized quant tables (Y rows first, then Cb, Cr) and reciprocals —
    # (3*TH, TW) instead of full (3, H, W).
    luma = _scaled_qtable(_LUMA_Q, quality)
    chroma = _scaled_qtable(_CHROMA_Q, quality)
    qt_y = np.tile(luma, (th // 8, tw // 8))
    qt_c = np.tile(chroma, (th // 8, tw // 8))
    qt_np = np.concatenate([qt_y, qt_c, qt_c], axis=0).astype(np.float32)
    qr_np = (1.0 / qt_np).astype(np.float32)
    qt = jnp.asarray(qt_np)
    qr = jnp.asarray(qr_np)

    out, bits = pl.pallas_call(
        _jpeg_tile_kernel,
        out_shape=(
            jax.ShapeDtypeStruct((n, 3, h, w), jnp.float32),
            jax.ShapeDtypeStruct((n, n_i, n_j), jnp.float32),
        ),
        grid=(n, n_i, n_j),
        in_specs=[
            pl.BlockSpec((1, 3, th, tw), lambda b, i, j: (b, 0, i, j)),
            pl.BlockSpec((th, th), lambda b, i, j: (0, 0)),
            pl.BlockSpec((tw, tw), lambda b, i, j: (0, 0)),
            pl.BlockSpec((3 * th, tw), lambda b, i, j: (0, 0)),
            pl.BlockSpec((3 * th, tw), lambda b, i, j: (0, 0)),
        ],
        out_specs=(
            pl.BlockSpec((1, 3, th, tw), lambda b, i, j: (b, 0, i, j)),
            pl.BlockSpec((1, 1, 1), lambda b, i, j: (b, i, j),
                         memory_space=pltpu.MemorySpace.SMEM),
        ),
        compiler_params=pltpu.CompilerParams(
            dimension_semantics=("parallel", "parallel", "parallel"),
            vmem_limit_bytes=32 * 1024 * 1024),
    )(x.astype(jnp.float32), dh, dw, qt, qr)

    # TODO(synk): the real TurboJPEG Huffman/RLE entropy coder, 4:2:0 chroma
    # subsampling, and JFIF header bytes have no Pallas equivalent; bpp is
    # estimated from quantized-coefficient magnitude categories.
    jpeg_bpp = jnp.sum(bits) / jnp.float32(n * h * w)
    return out, jpeg_bpp


if __name__ == "__main__":
    key = jax.random.PRNGKey(0)
    # Small NCHW image batch in [0, 1], matching the module's expected input.
    x = jax.random.uniform(key, (2, 3, 16, 16), dtype=jnp.float32)
    dec, bpp = turbo_jpeg_compression(x, quality=25)
    jax.block_until_ready((dec, bpp))
    assert dec.shape == (2, 3, 16, 16) and dec.dtype == jnp.float32
    assert bpp.shape == ()
    assert bool(jnp.all(jnp.isfinite(dec))) and bool(jnp.isfinite(bpp))

    # Exercise the multi-tile path (lane-dense 128-wide tiles, per-tile bits).
    x2 = jax.random.uniform(jax.random.PRNGKey(1), (1, 3, 16, 256),
                            dtype=jnp.float32)
    dec2, bpp2 = turbo_jpeg_compression(x2, quality=25)
    jax.block_until_ready((dec2, bpp2))
    assert dec2.shape == (1, 3, 16, 256)
    assert bool(jnp.isfinite(bpp2))

    print("KERNEL_OK")
</pallas_src>

<mosaic_0001>
module attributes {stable_mosaic.version = 11 : i64} {
  func.func @_jpeg_tile_kernel(%arg0: i32, %arg1: i32, %arg2: i32, %arg3: memref<1x3x16x16xf32, #tpu.memory_space<vmem>>, %arg4: memref<16x16xf32, #tpu.memory_space<vmem>>, %arg5: memref<16x16xf32, #tpu.memory_space<vmem>>, %arg6: memref<48x16xf32, #tpu.memory_space<vmem>>, %arg7: memref<48x16xf32, #tpu.memory_space<vmem>>, %arg8: memref<1x3x16x16xf32, #tpu.memory_space<vmem>>, %arg9: memref<1x1x1xf32, #tpu.memory_space<smem>>) attributes {dimension_semantics = [#tpu.dimension_semantics<parallel>, #tpu.dimension_semantics<parallel>, #tpu.dimension_semantics<parallel>], iteration_bounds = array<i64: 2, 1, 1>, scalar_prefetch = 0 : i64, scratch_operands = 0 : i64, tpu.core_type = #tpu.core_type<tc>, window_params = [{transform_indices = @transform_0, window_bounds = array<i64: 1, 3, 16, 16>}, {pipeline_mode = #tpu.pipeline_mode<synchronous>, transform_indices = @transform_1, window_bounds = array<i64: 16, 16>}, {pipeline_mode = #tpu.pipeline_mode<synchronous>, transform_indices = @transform_2, window_bounds = array<i64: 16, 16>}, {pipeline_mode = #tpu.pipeline_mode<synchronous>, transform_indices = @transform_3, window_bounds = array<i64: 48, 16>}, {pipeline_mode = #tpu.pipeline_mode<synchronous>, transform_indices = @transform_4, window_bounds = array<i64: 48, 16>}, {transform_indices = @transform_5, window_bounds = array<i64: 1, 3, 16, 16>}, {transform_indices = @transform_6, window_bounds = array<i64: 1, 1, 1>}]} {
    %c0 = arith.constant 0 : index
    %c0_0 = arith.constant 0 : index
    %c0_1 = arith.constant 0 : index
    %c0_2 = arith.constant 0 : index
    %0 = vector.load %arg3[%c0, %c0_0, %c0_1, %c0_2] : memref<1x3x16x16xf32, #tpu.memory_space<vmem>>, vector<1x1x16x16xf32>
    %1 = vector.shape_cast %0 : vector<1x1x16x16xf32> to vector<16x16xf32>
    %cst = arith.constant 0.000000e+00 : f32
    %cst_3 = arith.constant 1.000000e+00 : f32
    %2 = vector.broadcast %cst : f32 to vector<16x16xf32>
    %3 = arith.maximumf %2, %1 : vector<16x16xf32>
    %4 = vector.broadcast %cst_3 : f32 to vector<16x16xf32>
    %5 = arith.minimumf %4, %3 : vector<16x16xf32>
    %cst_4 = arith.constant 2.550000e+02 : f32
    %6 = vector.broadcast %cst_4 : f32 to vector<16x16xf32>
    %7 = arith.mulf %5, %6 : vector<16x16xf32>
    %8 = math.floor %7 : vector<16x16xf32>
    %c0_5 = arith.constant 0 : index
    %c1 = arith.constant 1 : index
    %c0_6 = arith.constant 0 : index
    %c0_7 = arith.constant 0 : index
    %9 = vector.load %arg3[%c0_5, %c1, %c0_6, %c0_7] : memref<1x3x16x16xf32, #tpu.memory_space<vmem>>, vector<1x1x16x16xf32>
    %10 = vector.shape_cast %9 : vector<1x1x16x16xf32> to vector<16x16xf32>
    %cst_8 = arith.constant 0.000000e+00 : f32
    %cst_9 = arith.constant 1.000000e+00 : f32
    %11 = vector.broadcast %cst_8 : f32 to vector<16x16xf32>
    %12 = arith.maximumf %11, %10 : vector<16x16xf32>
    %13 = vector.broadcast %cst_9 : f32 to vector<16x16xf32>
    %14 = arith.minimumf %13, %12 : vector<16x16xf32>
    %cst_10 = arith.constant 2.550000e+02 : f32
    %15 = vector.broadcast %cst_10 : f32 to vector<16x16xf32>
    %16 = arith.mulf %14, %15 : vector<16x16xf32>
    %17 = math.floor %16 : vector<16x16xf32>
    %c0_11 = arith.constant 0 : index
    %c2 = arith.constant 2 : index
    %c0_12 = arith.constant 0 : index
    %c0_13 = arith.constant 0 : index
    %18 = vector.load %arg3[%c0_11, %c2, %c0_12, %c0_13] : memref<1x3x16x16xf32, #tpu.memory_space<vmem>>, vector<1x1x16x16xf32>
    %19 = vector.shape_cast %18 : vector<1x1x16x16xf32> to vector<16x16xf32>
    %cst_14 = arith.constant 0.000000e+00 : f32
    %cst_15 = arith.constant 1.000000e+00 : f32
    %20 = vector.broadcast %cst_14 : f32 to vector<16x16xf32>
    %21 = arith.maximumf %20, %19 : vector<16x16xf32>
    %22 = vector.broadcast %cst_15 : f32 to vector<16x16xf32>
    %23 = arith.minimumf %22, %21 : vector<16x16xf32>
    %cst_16 = arith.constant 2.550000e+02 : f32
    %24 = vector.broadcast %cst_16 : f32 to vector<16x16xf32>
    %25 = arith.mulf %23, %24 : vector<16x16xf32>
    %26 = math.floor %25 : vector<16x16xf32>
    %cst_17 = arith.constant 2.990000e-01 : f32
    %27 = vector.broadcast %cst_17 : f32 to vector<16x16xf32>
    %28 = arith.mulf %27, %8 : vector<16x16xf32>
    %cst_18 = arith.constant 5.870000e-01 : f32
    %29 = vector.broadcast %cst_18 : f32 to vector<16x16xf32>
    %30 = arith.mulf %29, %17 : vector<16x16xf32>
    %31 = arith.addf %28, %30 : vector<16x16xf32>
    %cst_19 = arith.constant 1.140000e-01 : f32
    %32 = vector.broadcast %cst_19 : f32 to vector<16x16xf32>
    %33 = arith.mulf %32, %26 : vector<16x16xf32>
    %34 = arith.addf %31, %33 : vector<16x16xf32>
    %cst_20 = arith.constant 1.280000e+02 : f32
    %35 = vector.broadcast %cst_20 : f32 to vector<16x16xf32>
    %36 = arith.subf %34, %35 : vector<16x16xf32>
    %cst_21 = arith.constant -1.687360e-01 : f32
    %37 = vector.broadcast %cst_21 : f32 to vector<16x16xf32>
    %38 = arith.mulf %37, %8 : vector<16x16xf32>
    %cst_22 = arith.constant 3.312640e-01 : f32
    %39 = vector.broadcast %cst_22 : f32 to vector<16x16xf32>
    %40 = arith.mulf %39, %17 : vector<16x16xf32>
    %41 = arith.subf %38, %40 : vector<16x16xf32>
    %cst_23 = arith.constant 5.000000e-01 : f32
    %42 = vector.broadcast %cst_23 : f32 to vector<16x16xf32>
    %43 = arith.mulf %42, %26 : vector<16x16xf32>
    %44 = arith.addf %41, %43 : vector<16x16xf32>
    %cst_24 = arith.constant 5.000000e-01 : f32
    %45 = vector.broadcast %cst_24 : f32 to vector<16x16xf32>
    %46 = arith.mulf %45, %8 : vector<16x16xf32>
    %cst_25 = arith.constant 4.186880e-01 : f32
    %47 = vector.broadcast %cst_25 : f32 to vector<16x16xf32>
    %48 = arith.mulf %47, %17 : vector<16x16xf32>
    %49 = arith.subf %46, %48 : vector<16x16xf32>
    %cst_26 = arith.constant 8.131200e-02 : f32
    %50 = vector.broadcast %cst_26 : f32 to vector<16x16xf32>
    %51 = arith.mulf %50, %26 : vector<16x16xf32>
    %52 = arith.subf %49, %51 : vector<16x16xf32>
    %c0_27 = arith.constant 0 : index
    %c0_28 = arith.constant 0 : index
    %53 = vector.load %arg4[%c0_27, %c0_28] : memref<16x16xf32, #tpu.memory_space<vmem>>, vector<16x16xf32>
    %c0_29 = arith.constant 0 : index
    %c0_30 = arith.constant 0 : index
    %54 = vector.load %arg5[%c0_29, %c0_30] : memref<16x16xf32, #tpu.memory_space<vmem>>, vector<16x16xf32>
    %55 = tpu.concatenate %36, %44, %52 in 1 : vector<16x16xf32>, vector<16x16xf32>, vector<16x16xf32> -> vector<16x48xf32>
    %cst_31 = arith.constant dense<0.000000e+00> : vector<16x48xf32>
    %56 = tpu.matmul %53, %55, %cst_31 {dimension_numbers = #tpu.dot_dimension_numbers<[1], [0], [0], [1], [0, 0, 1, 1], [], []>} : vector<16x16xf32>, vector<16x48xf32>, vector<16x48xf32> -> vector<16x48xf32>
    %57 = vector.extract_strided_slice %56 {offsets = [0, 0], sizes = [16, 16], strides = [1, 1]} : vector<16x48xf32> to vector<16x16xf32>
    %58 = vector.extract_strided_slice %56 {offsets = [0, 16], sizes = [16, 16], strides = [1, 1]} : vector<16x48xf32> to vector<16x16xf32>
    %59 = vector.extract_strided_slice %56 {offsets = [0, 32], sizes = [16, 16], strides = [1, 1]} : vector<16x48xf32> to vector<16x16xf32>
    %60 = tpu.concatenate %57, %58, %59 in 0 : vector<16x16xf32>, vector<16x16xf32>, vector<16x16xf32> -> vector<48x16xf32>
    %cst_32 = arith.constant dense<0.000000e+00> : vector<48x16xf32>
    %61 = tpu.matmul %60, %54, %cst_32 {dimension_numbers = #tpu.dot_dimension_numbers<[1], [1], [0], [0], [0, 0, 1, 0], [], []>} : vector<48x16xf32>, vector<16x16xf32>, vector<48x16xf32> -> vector<48x16xf32>
    %c0_33 = arith.constant 0 : index
    %c0_34 = arith.constant 0 : index
    %62 = vector.load %arg7[%c0_33, %c0_34] : memref<48x16xf32, #tpu.memory_space<vmem>>, vector<48x16xf32>
    %63 = arith.mulf %61, %62 : vector<48x16xf32>
    %64 = math.roundeven %63 : vector<48x16xf32>
    %65 = math.absf %64 : vector<48x16xf32>
    %66 = tpu.bitcast %65 : vector<48x16xf32> -> vector<48x16xi32>
    %c23_i32 = arith.constant 23 : i32
    %67 = vector.broadcast %c23_i32 : i32 to vector<48x16xi32>
    %68 = arith.shrsi %66, %67 : vector<48x16xi32>
    %c126_i32 = arith.constant 126 : i32
    %69 = vector.broadcast %c126_i32 : i32 to vector<48x16xi32>
    %70 = arith.subi %68, %69 : vector<48x16xi32>
    %71 = arith.sitofp %70 : vector<48x16xi32> to vector<48x16xf32>
    %cst_35 = arith.constant 0.000000e+00 : f32
    %72 = vector.broadcast %cst_35 : f32 to vector<48x16xf32>
    %73 = arith.cmpf ogt, %65, %72 : vector<48x16xf32>
    %cst_36 = arith.constant 4.000000e+00 : f32
    %74 = vector.broadcast %cst_36 : f32 to vector<48x16xf32>
    %75 = arith.addf %71, %74 : vector<48x16xf32>
    %cst_37 = arith.constant 0.000000e+00 : f32
    %76 = vector.broadcast %cst_37 : f32 to vector<48x16xf32>
    %77 = arith.select %73, %75, %76 : vector<48x16xi1>, vector<48x16xf32>
    %78 = vector.shape_cast %77 : vector<48x16xf32> to vector<1x48x16xf32>
    %cst_38 = arith.constant dense<0.000000e+00> : vector<1xf32>
    %79 = vector.multi_reduction <add>, %78, %cst_38 [1, 2] : vector<1x48x16xf32> to vector<1xf32>
    %80 = vector.shape_cast %79 : vector<1xf32> to vector<1x1x1xf32>
    %81 = vector.extract %80[0, 0, 0] : f32 from vector<1x1x1xf32>
    %c0_39 = arith.constant 0 : index
    %c0_40 = arith.constant 0 : index
    %c0_41 = arith.constant 0 : index
    %82 = memref.load %arg9[%c0_39, %c0_40, %c0_41] : memref<1x1x1xf32, #tpu.memory_space<smem>>
    memref.store %81, %arg9[%c0_39, %c0_40, %c0_41] : memref<1x1x1xf32, #tpu.memory_space<smem>>
    %c0_42 = arith.constant 0 : index
    %c0_43 = arith.constant 0 : index
    %83 = vector.load %arg6[%c0_42, %c0_43] : memref<48x16xf32, #tpu.memory_space<vmem>>, vector<48x16xf32>
    %84 = arith.mulf %64, %83 : vector<48x16xf32>
    %cst_44 = arith.constant dense<0.000000e+00> : vector<48x16xf32>
    %85 = tpu.matmul %84, %54, %cst_44 {dimension_numbers = #tpu.dot_dimension_numbers<[1], [0], [0], [1], [0, 0, 1, 1], [], []>} : vector<48x16xf32>, vector<16x16xf32>, vector<48x16xf32> -> vector<48x16xf32>
    %86 = vector.extract_strided_slice %85 {offsets = [0, 0], sizes = [16, 16], strides = [1, 1]} : vector<48x16xf32> to vector<16x16xf32>
    %87 = vector.extract_strided_slice %85 {offsets = [16, 0], sizes = [16, 16], strides = [1, 1]} : vector<48x16xf32> to vector<16x16xf32>
    %88 = vector.extract_strided_slice %85 {offsets = [32, 0], sizes = [16, 16], strides = [1, 1]} : vector<48x16xf32> to vector<16x16xf32>
    %89 = tpu.concatenate %86, %87, %88 in 1 : vector<16x16xf32>, vector<16x16xf32>, vector<16x16xf32> -> vector<16x48xf32>
    %cst_45 = arith.constant dense<0.000000e+00> : vector<16x48xf32>
    %90 = tpu.matmul %53, %89, %cst_45 {dimension_numbers = #tpu.dot_dimension_numbers<[0], [0], [1], [1], [0, 1, 1, 1], [], []>} : vector<16x16xf32>, vector<16x48xf32>, vector<16x48xf32> -> vector<16x48xf32>
    %91 = vector.extract_strided_slice %90 {offsets = [0, 0], sizes = [16, 16], strides = [1, 1]} : vector<16x48xf32> to vector<16x16xf32>
    %cst_46 = arith.constant 1.280000e+02 : f32
    %92 = vector.broadcast %cst_46 : f32 to vector<16x16xf32>
    %93 = arith.addf %91, %92 : vector<16x16xf32>
    %94 = vector.extract_strided_slice %90 {offsets = [0, 16], sizes = [16, 16], strides = [1, 1]} : vector<16x48xf32> to vector<16x16xf32>
    %95 = vector.extract_strided_slice %90 {offsets = [0, 32], sizes = [16, 16], strides = [1, 1]} : vector<16x48xf32> to vector<16x16xf32>
    %cst_47 = arith.constant 1.402000e+00 : f32
    %96 = vector.broadcast %cst_47 : f32 to vector<16x16xf32>
    %97 = arith.mulf %96, %95 : vector<16x16xf32>
    %98 = arith.addf %93, %97 : vector<16x16xf32>
    %cst_48 = arith.constant 3.441360e-01 : f32
    %99 = vector.broadcast %cst_48 : f32 to vector<16x16xf32>
    %100 = arith.mulf %99, %94 : vector<16x16xf32>
    %101 = arith.subf %93, %100 : vector<16x16xf32>
    %cst_49 = arith.constant 7.141360e-01 : f32
    %102 = vector.broadcast %cst_49 : f32 to vector<16x16xf32>
    %103 = arith.mulf %102, %95 : vector<16x16xf32>
    %104 = arith.subf %101, %103 : vector<16x16xf32>
    %cst_50 = arith.constant 1.772000e+00 : f32
    %105 = vector.broadcast %cst_50 : f32 to vector<16x16xf32>
    %106 = arith.mulf %105, %94 : vector<16x16xf32>
    %107 = arith.addf %93, %106 : vector<16x16xf32>
    %108 = math.roundeven %98 : vector<16x16xf32>
    %cst_51 = arith.constant 0.000000e+00 : f32
    %cst_52 = arith.constant 2.550000e+02 : f32
    %109 = vector.broadcast %cst_51 : f32 to vector<16x16xf32>
    %110 = arith.maximumf %109, %108 : vector<16x16xf32>
    %111 = vector.broadcast %cst_52 : f32 to vector<16x16xf32>
    %112 = arith.minimumf %111, %110 : vector<16x16xf32>
    %cst_53 = arith.constant 0.00392156886 : f32
    %113 = vector.broadcast %cst_53 : f32 to vector<16x16xf32>
    %114 = arith.mulf %112, %113 : vector<16x16xf32>
    %c0_54 = arith.constant 0 : index
    %c0_55 = arith.constant 0 : index
    %c0_56 = arith.constant 0 : index
    %c0_57 = arith.constant 0 : index
    %115 = vector.load %arg8[%c0_54, %c0_55, %c0_56, %c0_57] : memref<1x3x16x16xf32, #tpu.memory_space<vmem>>, vector<1x1x16x16xf32>
    %116 = vector.shape_cast %115 : vector<1x1x16x16xf32> to vector<16x16xf32>
    %117 = vector.shape_cast %114 : vector<16x16xf32> to vector<1x1x16x16xf32>
    tpu.vector_store %arg8[%c0_54, %c0_55, %c0_56, %c0_57], %117 {strides = array<i32>} : memref<1x3x16x16xf32, #tpu.memory_space<vmem>>, vector<1x1x16x16xf32>,
    %118 = math.roundeven %104 : vector<16x16xf32>
    %cst_58 = arith.constant 0.000000e+00 : f32
    %cst_59 = arith.constant 2.550000e+02 : f32
    %119 = vector.broadcast %cst_58 : f32 to vector<16x16xf32>
    %120 = arith.maximumf %119, %118 : vector<16x16xf32>
    %121 = vector.broadcast %cst_59 : f32 to vector<16x16xf32>
    %122 = arith.minimumf %121, %120 : vector<16x16xf32>
    %cst_60 = arith.constant 0.00392156886 : f32
    %123 = vector.broadcast %cst_60 : f32 to vector<16x16xf32>
    %124 = arith.mulf %122, %123 : vector<16x16xf32>
    %c0_61 = arith.constant 0 : index
    %c1_62 = arith.constant 1 : index
    %c0_63 = arith.constant 0 : index
    %c0_64 = arith.constant 0 : index
    %125 = vector.load %arg8[%c0_61, %c1_62, %c0_63, %c0_64] : memref<1x3x16x16xf32, #tpu.memory_space<vmem>>, vector<1x1x16x16xf32>
    %126 = vector.shape_cast %125 : vector<1x1x16x16xf32> to vector<16x16xf32>
    %127 = vector.shape_cast %124 : vector<16x16xf32> to vector<1x1x16x16xf32>
    tpu.vector_store %arg8[%c0_61, %c1_62, %c0_63, %c0_64], %127 {strides = array<i32>} : memref<1x3x16x16xf32, #tpu.memory_space<vmem>>, vector<1x1x16x16xf32>,
    %128 = math.roundeven %107 : vector<16x16xf32>
    %cst_65 = arith.constant 0.000000e+00 : f32
    %cst_66 = arith.constant 2.550000e+02 : f32
    %129 = vector.broadcast %cst_65 : f32 to vector<16x16xf32>
    %130 = arith.maximumf %129, %128 : vector<16x16xf32>
    %131 = vector.broadcast %cst_66 : f32 to vector<16x16xf32>
    %132 = arith.minimumf %131, %130 : vector<16x16xf32>
    %cst_67 = arith.constant 0.00392156886 : f32
    %133 = vector.broadcast %cst_67 : f32 to vector<16x16xf32>
    %134 = arith.mulf %132, %133 : vector<16x16xf32>
    %c0_68 = arith.constant 0 : index
    %c2_69 = arith.constant 2 : index
    %c0_70 = arith.constant 0 : index
    %c0_71 = arith.constant 0 : index
    %135 = vector.load %arg8[%c0_68, %c2_69, %c0_70, %c0_71] : memref<1x3x16x16xf32, #tpu.memory_space<vmem>>, vector<1x1x16x16xf32>
    %136 = vector.shape_cast %135 : vector<1x1x16x16xf32> to vector<16x16xf32>
    %137 = vector.shape_cast %134 : vector<16x16xf32> to vector<1x1x16x16xf32>
    tpu.vector_store %arg8[%c0_68, %c2_69, %c0_70, %c0_71], %137 {strides = array<i32>} : memref<1x3x16x16xf32, #tpu.memory_space<vmem>>, vector<1x1x16x16xf32>,
    return
  }
  func.func @transform_0(%arg0: i32, %arg1: i32, %arg2: i32) -> (i32, i32, i32, i32) {
    %c0_i32 = arith.constant 0 : i32
    %c0_i32_0 = arith.constant 0 : i32
    return %arg0, %c0_i32, %arg1, %arg2 : i32, i32, i32, i32
  }
  func.func @transform_1(%arg0: i32, %arg1: i32, %arg2: i32) -> (i32, i32) {
    %c0_i32 = arith.constant 0 : i32
    %c0_i32_0 = arith.constant 0 : i32
    %c0_i32_1 = arith.constant 0 : i32
    return %c0_i32, %c0_i32_0 : i32, i32
  }
  func.func @transform_2(%arg0: i32, %arg1: i32, %arg2: i32) -> (i32, i32) {
    %c0_i32 = arith.constant 0 : i32
    %c0_i32_0 = arith.constant 0 : i32
    %c0_i32_1 = arith.constant 0 : i32
    return %c0_i32, %c0_i32_0 : i32, i32
  }
  func.func @transform_3(%arg0: i32, %arg1: i32, %arg2: i32) -> (i32, i32) {
    %c0_i32 = arith.constant 0 : i32
    %c0_i32_0 = arith.constant 0 : i32
    %c0_i32_1 = arith.constant 0 : i32
    return %c0_i32, %c0_i32_0 : i32, i32
  }
  func.func @transform_4(%arg0: i32, %arg1: i32, %arg2: i32) -> (i32, i32) {
    %c0_i32 = arith.constant 0 : i32
    %c0_i32_0 = arith.constant 0 : i32
    %c0_i32_1 = arith.constant 0 : i32
    return %c0_i32, %c0_i32_0 : i32, i32
  }
  func.func @transform_5(%arg0: i32, %arg1: i32, %arg2: i32) -> (i32, i32, i32, i32) {
    %c0_i32 = arith.constant 0 : i32
    %c0_i32_0 = arith.constant 0 : i32
    return %arg0, %c0_i32, %arg1, %arg2 : i32, i32, i32, i32
  }
  func.func @transform_6(%arg0: i32, %arg1: i32, %arg2: i32) -> (i32, i32, i32) {
    %c0_i32 = arith.constant 0 : i32
    return %arg0, %arg1, %arg2 : i32, i32, i32
  }
}

</mosaic_0001>

<bundles_post_ra>
// kernel: turbo_jpeg_compression.1
= control target key start
LH: loop header
LB: loop body
LE: loop exit
PB: predicated region body
PF: predicated region fallthrough
CT: control target
= control target key end

     0   :  { %12 = vsyncpa [#allocation3], 0  ;;  %s2112_s0 = inlined_call_operand.hbm [shape: f32[2,3,16,16], index: 0, kind: input, shape index: {}]   ;;  %s2113_s1 = inlined_call_operand.vmem [shape: f32[16,16], index: 1, kind: input, shape index: {}, may-alias: {1,2}]   ;;  %s2114_s2 = inlined_call_operand.vmem [shape: f32[16,16], index: 2, kind: input, shape index: {}, may-alias: {1,2}]   ;;  %s2115_s3 = inlined_call_operand.hbm [shape: f32[48,16], index: 3, kind: input, shape index: {}]   ;;  %s2116_s4 = inlined_call_operand.hbm [shape: f32[48,16], index: 4, kind: input, shape index: {}]   ;;  %s2117_s5 = inlined_call_operand.hbm [shape: f32[2,3,16,16], index: 5, kind: output, shape index: {0}]   ;;  %s2118_s6 = inlined_call_operand.vmem [shape: f32[2,1,1], index: 6, kind: output, shape index: {1}]  }
   0x1   :  { %14 = vsyncpa [#allocation3 + $0x1], 0 }
   0x2   :  { %15 = vsyncpa [#allocation7], 0 }
   0x3   :  { %16 = vsyncpa [#allocation4], 0 }
   0x4   :  { %18 = vsyncpa [#allocation4 + $0x1], 0 }
   0x5   :  { %19 = vsyncpa [#allocation5], 0 }
   0x6   :  { %21 = vsyncpa [#allocation5 + $0x1], 0  ;;  %s1746_s21 = smov 0   ;;  %s1748_s22 = smov 0  }
   0x7   :  { %s1750_s23 = smov 0   ;;  %s1752_s24 = smov 0  }
   0x8   :  { %s1754_s25 = smov 0   ;;  %s1756_s26 = smov 0  }
   0x9 LB: > { %s1249_s27 = sadd.s32 4294967295, %s1697_s26   ;;  %s1250_s28 = sadd.s32 4294967294, %s1697_s26   ;;  %s1697_s26 = sphi %s1756_s26, %s27_s26   ;;  %s1693_s25 = sphi %s1754_s25, %s2151_s25   ;;  %s1689_s24 = sphi %s1752_s24, %s2150_s24   ;;  %s1685_s23 = sphi %s1750_s23, %s2149_s23   ;;  %s1681_s22 = sphi %s1748_s22, %s2148_s22   ;;  %s1677_s21 = sphi %s1746_s21, %s2147_s21  }
   0xa   : > { %p70_p0 = scmp.ne.s32.totalorder %s1681_s22, %s1677_s21  ;;  %p1780_p1 = scmp.eq.s32.totalorder %s1249_s27, 0 }
   0xb   : > { %p1784_p2 = scmp.eq.s32.totalorder %s1249_s27, 1  ;;  %p188_p3 = scmp.eq.s32.totalorder %s1250_s28, 1 }
   0xc   : > { %s2129_s29 = scalar_select %p1780_p1, 1, 0 }
   0xd   : > { %s2130_s30 = scalar_select %p1784_p2, 1, 0 }
   0xe   : > { %p1790_p4 = por %p1780_p1, %p70_p0  ;;  %p1251_p5 = scmp.ge.s32.totalorder %s1697_s26, 1 }
   0xf   : > { %p1795_p6 = por %p188_p3, %p70_p0  ;;  %p225_p7 = scmp.lt.s32.totalorder %s1697_s26, 3 }
  0x10   : > { %s2131_s7 = scalar_select %p1790_p4, 1, 0 }
  0x11   : > { %s2132_s8 = scalar_select %p1795_p6, 1, 0 }
  0x12   : > { %p1800_p8 = pnand %p1251_p5, %p225_p7  ;;  %s1699_s10 = smov [#allocation6]  }
  0x13   : > { %2133 = sst [smem:[#allocation15_spill]] %s2132_s8  ;;  %s243_s11 = sshll.u32 %s1699_s10, 4  ;;  %s244_s11 = int_to_ptr.vmem [resolvable:$true] %s243_s11 }
  0x14   : > { %s2134_s9 = scalar_select %p1800_p8, 1, 0 }
  0x15   : > { %p1412_p9 = pneg %p1800_p8  ;;  %s1700_s13 = smov [#allocation8]  }
  0x16   : > { %s256_s14 = sshll.u32 %s1700_s13, 4  ;;  %s1507_s17 = scalar_lea.hbm %s2115_s3, 768  ;;  %s1812_s14 = int_to_ptr.vmem [resolvable:$true] %s256_s14 }
  0x17   : > { %p1808_p10 = pnand %p1412_p9, %p1780_p1  ;;  %p1508_p11 = scmp.ne.s32.totalorder %s2115_s3, %s1507_s17 }
  0x18   : > { %p1514_p3 = scmp.lt.u32.totalorder %s1507_s17, %s2115_s3 }
  0x19   : > { %p1509_p12 = pneg %p1808_p10 }
  0x1b   : > { %p1510_p13 = pnand %p1509_p12, %p1508_p11 }
  0x1d   : > { %p1511_p0 = pneg %p1510_p13 }
  0x1f   : > { %p1516_p5 = pnand %p1514_p3, %p1511_p0 }
  0x21   : > { %1519 = shalt.err (!%p1516_p5)
}
  0x22   : > { %s1520_s28 = scalar_lea.vmem %s244_s11, 768  ;;  %p1528_p1 = scmp.lt.s32.totalorder %s244_s11, %s244_s11 }
  0x23   : > { %p1521_p7 = scmp.ne.s32.totalorder %s244_s11, %s1520_s28  ;;  %p1529_p4 = scmp.lt.s32.totalorder %s1520_s28, %s1520_s28 }
  0x25   : > { %p1523_p9 = pnand %p1521_p7, %p1509_p12  ;;  %p1530_p8 = por %p1529_p4, %p1528_p1 }
  0x27   : > { %p1524_p6 = pneg %p1523_p9 }
  0x29   : > { %p1531_p2 = pnand %p1530_p8, %p1524_p6 }
  0x2b   : > { %1534 = shalt.err (!%p1531_p2)
}
  0x2c   : > { %s2126_s10 = smov 128   ;;  %s2127_s13 = smov 8  }
  0x2d   : > { %1415 = dma.hbm_to_vmem [thread:$0]  (!%p1808_p10), %s2115_s3, 768, %s244_s11, [#allocation7], %s2126_s10, %s2126_s10, %s2127_s13  }
  0x2e   : > { %s1535_s19 = scalar_lea.hbm %s2116_s4, 768 }
  0x2f   : > { %p1536_p1 = scmp.ne.s32.totalorder %s2116_s4, %s1535_s19  ;;  %p1542_p6 = scmp.lt.u32.totalorder %s1535_s19, %s2116_s4 }
  0x31   : > { %p1538_p2 = pnand %p1536_p1, %p1509_p12 }
  0x33   : > { %p1539_p4 = pneg %p1538_p2 }
  0x35   : > { %p1544_p8 = pnand %p1542_p6, %p1539_p4 }
  0x37   : > { %1547 = shalt.err (!%p1544_p8)
}
  0x38   : > { %s1548_s11 = scalar_lea.vmem %s1812_s14, 768  ;;  %p1556_p3 = scmp.lt.s32.totalorder %s1812_s14, %s1812_s14 }
  0x39   : > { %p1549_p11 = scmp.ne.s32.totalorder %s1812_s14, %s1548_s11  ;;  %p1557_p5 = scmp.lt.s32.totalorder %s1548_s11, %s1548_s11 }
  0x3b   : > { %p1551_p13 = pnand %p1549_p11, %p1509_p12  ;;  %p1558_p7 = por %p1557_p5, %p1556_p3 }
  0x3d   : > { %p1552_p0 = pneg %p1551_p13 }
  0x3f   : > { %p1559_p9 = pnand %p1558_p7, %p1552_p0 }
  0x41   : > { %1562 = shalt.err (!%p1559_p9)
}
  0x42   : > { %1418 = dma.hbm_to_vmem [thread:$0]  (!%p1808_p10), %s2116_s4, 768, %s1812_s14, [#allocation7], %s2126_s10, %s2126_s10, %s2127_s13  }
  0x43   : > { %s46_s12 = sadd.s32 1, %s1693_s25  ;;  %s57_s16 = sadd.s32 1, %s1685_s23 }
  0x44   : > { %p48_p12 = scmp.ge.s32.totalorder %s46_s12, 2  ;;  %p64_p1 = scmp.ne.s32.totalorder %s1685_s23, %s1681_s22 }
  0x45   : > { %p65_p2 = scmp.eq.s32.totalorder %s1697_s26, 0  ;;  %p2128_p4 = scmp.lt.s32.totalorder %s1697_s26, 2 }
  0x46   : > { %s2153_s12 = smov (%p48_p12, %s46_s12), 0  ;;  %p2136_p8 = scmp.ne.s32.totalorder %s2130_s30, 0 }
  0x47   : > { %p66_p6 = por %p65_p2, %p64_p1  ;;  %s50_s18 = ssub.s32 %s1693_s25, %s2153_s12 }
  0x48   : > { %p1877_p11 = por %p2136_p8, %p64_p1  ;;  %s270_s19 = sand.u32 1, %s1685_s23  }
  0x49   : > { %p55_p13 = scmp.eq.s32.totalorder %s50_s18, 0  ;;  %s1380_s14 = smul.u32 48, %s270_s19 }
  0x4a   : > { %p1886_p10 = pnand %p2128_p4, %p66_p6  ;;  %s1381_s28 = smul.u32 768, %s1693_s25 }
  0x4b   : > { %s1891_s27 = scalar_select %p55_p13, %s1685_s23, %s57_s16  }
  0x4c   : > { %s274_s11 = scalar_lea.vmem [#allocation2], %s1380_s14  ;;  %s1897_s10 = scalar_lea.hbm %s2112_s0, %s1381_s28 }
  0x4d   : > { %s284_s30 = sshll.u32 %s274_s11, 4  ;;  %s1901_s18 = scalar_lea.sflag [#allocation3], %s270_s19  ;;  %s1899_s30 = int_to_ptr.vmem [resolvable:$true] %s284_s30 }
  0x4e   : > { %s1563_s13 = scalar_lea.hbm %s1897_s10, 768  ;;  %p1565_p3 = pneg %p1886_p10 }
  0x4f   : > { %p1564_p0 = scmp.ne.s32.totalorder %s1897_s10, %s1563_s13  ;;  %s1568_s28 = scalar_lea.hbm %s2112_s0, 1536 }
  0x50   : > { %p1569_p9 = scmp.lt.u32.totalorder %s1897_s10, %s2112_s0  ;;  %p1570_p12 = scmp.lt.u32.totalorder %s1568_s28, %s1563_s13 }
  0x51   : > { %p1566_p5 = pnand %p1565_p3, %p1564_p0  ;;  %p1572_p2 = scmp.lt.u32.totalorder %s1563_s13, %s1897_s10 }
  0x52   : > { %p1571_p1 = por %p1570_p12, %p1569_p9 }
  0x53   : > { %p1567_p7 = pneg %p1566_p5 }
  0x54   : > { %p1573_p6 = por %p1572_p2, %p1571_p1 }
  0x56   : > { %p1574_p8 = pnand %p1573_p6, %p1567_p7 }
  0x58   : > { %1577 = shalt.err (!%p1574_p8)
}
  0x59   : > { %s1578_s19 = scalar_lea.vmem %s1899_s30, 768  ;;  %s1703_s15 = smov [#allocation2]  }
  0x5a   : > { %p1579_p13 = scmp.ne.s32.totalorder %s1899_s30, %s1578_s19  ;;  %s1583_s16 = sshll.u32 %s1703_s15, 4  ;;  %s1584_s16 = int_to_ptr.vmem [resolvable:$false] %s1583_s16 }
  0x5b   : > { %s1585_s14 = scalar_lea.vmem %s1584_s16, 1536  ;;  %p1586_p4 = scmp.lt.s32.totalorder %s1899_s30, %s1584_s16 }
  0x5c   : > { %p1581_p0 = pnand %p1579_p13, %p1565_p3  ;;  %p1587_p9 = scmp.lt.s32.totalorder %s1585_s14, %s1578_s19 }
  0x5e   : > { %p1582_p5 = pneg %p1581_p0  ;;  %p1588_p12 = por %p1587_p9, %p1586_p4 }
  0x60   : > { %p1589_p1 = pnand %p1588_p12, %p1582_p5 }
  0x62   : > { %1592 = shalt.err (!%p1589_p1)
}
  0x63   : > { %s2139_s13 = smov 8   ;;  %s2140_s28 = smov 128  }
  0x64   : > { %1422 = dma.hbm_to_vmem [thread:$0]  (!%p1886_p10), %s1897_s10, 768, %s1899_s30, %s1901_s18, %s2140_s28, %s2140_s28, %s2139_s13  }
  0x65   : > { %p2141_p3 = scmp.ne.s32.totalorder %s2134_s9, 0 }
  0x66   : > { %s1935_s11 = sand.u32 (!%p2141_p3), 1, %s1681_s22   ;;  %p2142_p4 = scmp.ne.s32.totalorder (!%p2141_p3), %s2131_s7, 0 }
  0x67   : > { %296 = sbr.rel (%p2141_p3) target bundleno = 1568 (0x620), region = 40  ;;  %s299_s19 = scalar_lea.sflag (!%p2141_p3), [#allocation3], %s1935_s11 }
  0x68   : > { %s1382_s8 = smul.u32 (!%p2141_p3), 48, %s1935_s11 }
  0x6a   : > { %s302_s20 = scalar_lea.vmem (!%p2141_p3), [#allocation2], %s1382_s8 }
  0x6e   : > { %1660 = dma.done.wait (%p2142_p4), %s299_s19, 768  }
  0x6f   : > { %1662 = vsyncadd (%p2142_p4), %s299_s19, 4294966528  ;;  %p2143_p10 = scmp.ne.s32.totalorder %s2129_s29, 0 }
  0x71   : > { %1664 = dma.done.wait (%p2143_p10), [#allocation7], 1536  }
  0x72   : > { %1666 = vsyncadd (%p2143_p10), [#allocation7], 4294965760  ;;  %v346_v0 = vld [vmem:[%s302_s20] sm:$0xff]  ;;  %v347_v1 = vld [vmem:[%s302_s20 + $0x8] sm:$0xff]  ;;  %vm430_vm0 = vcmask 130048   ;;  %s1704_s9 = smov 16   ;;  %s1105_s30 = scalar_lea.vmem %s2118_s6, %s1689_s24 }
  0x73   : > { %v1260_v2 = vld [vmem:[%s302_s20 + $0x10] sm:$0xff]  ;;  %v348_v3 = vmax.f32 %v346_v0, 0.0  ;;  %v349_v4 = vmax.f32 %v347_v1, 0.0  ;;  %v1261_v5 = vld [vmem:[%s302_s20 + $0x18] sm:$0xff]  ;;  %v1262_v7 = vld [vmem:[%s302_s20 + $0x20] sm:$0xff]  ;;  %s1705_s16 = smov 32  }
  0x74   : > { %v359_v6 = vmax.f32 %v1260_v2, 0.0  ;;  %v1263_v8 = vld [vmem:[%s302_s20 + $0x28] sm:$0xff]  ;;  %v360_v9 = vmax.f32 %v1261_v5, 0.0  ;;  %v370_v10 = vmax.f32 %v1262_v7, 0.0  ;;  %v1952_v56 = vld [vmem:[%s2113_s1] sm:$0xff]  ;;  %vm1367_vm1 = vmpackc.low %vm430_vm0, %vm430_vm0  ;;  %vm433_vm2 = vcmask 261120  }
  0x75   : > { %v371_v11 = vmax.f32 %v1263_v8, 0.0  ;;  %v350_v12 = vmin.f32 %v348_v3, 1.0  ;;  %v351_v13 = vmin.f32 %v349_v4, 1.0  ;;  %1326 = vmatprep.mubr.msk.f32.mxu0 %vm430_vm0, %v1952_v56  ;;  %v412_v63 = vld [vmem:[%s2114_s2] sm:$0xff]  ;;  %v413_v0 = vld [vmem:[%s2114_s2 + $0x8] sm:$0xff]  ;;  %s1706_s28 = smov 96  }
  0x76   : > { %v361_v14 = vmin.f32 %v359_v6, 1.0  ;;  %v362_v15 = vmin.f32 %v360_v9, 1.0  ;;  %v372_v16 = vmin.f32 %v370_v10, 1.0  ;;  %v1366_v1 = vpack.c.bf16 %v413_v0, %v412_v63  ;;  %s1707_s19 = smov 112   ;;  %s1259_s20 = sshll.u32 %s1935_s11, 7 }
  0x77   : > { %v373_v17 = vmin.f32 %v371_v11, 1.0  ;;  %v352_v18 = vmul.f32 255.0, %v350_v12  ;;  %v353_v19 = vmul.f32 255.0, %v351_v13  ;;  %s2010_s7 = scalar_lea.smem [#allocation10], %s1259_s20  ;;  %s1107_s18 = sshll.u32 %s1105_s30, 4  ;;  %s1108_s18 = int_to_ptr.vmem [resolvable:$true] %s1107_s18 }
  0x78   : > { %v363_v20 = vmul.f32 255.0, %v361_v14  ;;  %v364_v21 = vmul.f32 255.0, %v362_v15  ;;  %v374_v22 = vmul.f32 255.0, %v372_v16  ;;  %1368 = vmatprep.subr.msk.bf16.mxu1 %vm1367_vm1, %v1366_v1  ;;  %v1973_v15 = vld [vmem:[%s2113_s1 + $0x8] sm:$0xff]  ;;  %s1074_s15 = scalar_lea.sflag [#allocation5], %s1935_s11 }
  0x79   : > { %v375_v23 = vmul.f32 255.0, %v373_v17  ;;  %v354_v24 = vfloor.f32 %v352_v18  ;;  %v355_v25 = vfloor.f32 %v353_v19  ;;  %1371 = vmatpush3.bf16.xpose.msk.msra.mxu1 %vm1367_vm1, %v1366_v1 }
  0x7a   : > { %v365_v26 = vfloor.f32 %v363_v20  ;;  %v366_v27 = vfloor.f32 %v364_v21  ;;  %v376_v28 = vfloor.f32 %v374_v22  ;;  %v641_v22 = vld [vmem:[#allocation8 + $0x8] sm:$0xff] }
  0x7b   : > { %v377_v29 = vfloor.f32 %v375_v23  ;;  %v390_v30 = vmul.f32 -0.168736, %v354_v24  ;;  %v391_v31 = vmul.f32 -0.168736, %v355_v25  ;;  %v400_v36 = vmul.f32 0.5, %v354_v24  ;;  %v640_v23 = vld [vmem:[#allocation8] sm:$0xff] }
  0x7c   : > { %v392_v32 = vmul.f32 0.331264, %v365_v26  ;;  %v393_v33 = vmul.f32 0.331264, %v366_v27  ;;  %v396_v34 = vmul.f32 0.5, %v376_v28  ;;  %v401_v38 = vmul.f32 0.5, %v355_v25 }
  0x7d   : > { %v397_v35 = vmul.f32 0.5, %v377_v29  ;;  %v402_v39 = vmul.f32 0.418688, %v365_v26  ;;  %v403_v40 = vmul.f32 0.418688, %v366_v27 }
  0x7e   : > { %v394_v37 = vsub.f32 %v390_v30, %v392_v32  ;;  %v395_v41 = vsub.f32 %v391_v31, %v393_v33  ;;  %v406_v42 = vmul.f32 0.081312, %v376_v28  ;;  %v407_v43 = vmul.f32 0.081312, %v377_v29  ;;  %v729_v30 = vld [vmem:[#allocation6 + $0x8] sm:$0xff] }
  0x7f   : > { %v378_v44 = vmul.f32 0.299, %v354_v24  ;;  %v404_v46 = vsub.f32 %v400_v36, %v402_v39  ;;  %v405_v47 = vsub.f32 %v401_v38, %v403_v40  ;;  %v379_v48 = vmul.f32 0.299, %v355_v25 }
  0x80   : > { %v398_v45 = vadd.f32 %v396_v34, %v394_v37  ;;  %v399_v49 = vadd.f32 %v397_v35, %v395_v41  ;;  %v380_v50 = vmul.f32 0.587, %v365_v26  ;;  %v381_v51 = vmul.f32 0.587, %v366_v27 }
  0x81   : > { %v384_v52 = vmul.f32 0.114, %v376_v28  ;;  %v408_v53 = vsub.f32 %v404_v46, %v406_v42  ;;  %v409_v54 = vsub.f32 %v405_v47, %v407_v43  ;;  %v385_v55 = vmul.f32 0.114, %v377_v29  ;;  %v728_v29 = vld [vmem:[#allocation6] sm:$0xff] }
  0x82   : > { %v1487_v57 = vpack.i.bf16 %v399_v49, %v398_v45  ;;  %v382_v58 = vadd.f32 %v380_v50, %v378_v44  ;;  %v383_v59 = vadd.f32 %v381_v51, %v379_v48  ;;  %v643_v49 = vld [vmem:[#allocation8 + $0x18] sm:$0xff]  ;;  %v642_v50 = vld [vmem:[#allocation8 + $0x10] sm:$0xff] }
  0x83   : > { %v1492_v60 = vpack.i.bf16 %v409_v54, %v408_v53 }
  0x84   : > { %1488 = vrot.lane.b32.xlu0 %v1487_v57, %s1704_s9  ;;  %v386_v61 = vadd.f32 %v384_v52, %v382_v58  ;;  %v387_v62 = vadd.f32 %v385_v55, %v383_v59  ;;  %v645_v55 = vld [vmem:[#allocation8 + $0x28] sm:$0xff]  ;;  %v730_v58 = vld [vmem:[#allocation6 + $0x10] sm:$0xff] }
  0x85   : > { %v644_v59 = vld [vmem:[#allocation8 + $0x20] sm:$0xff] }
  0x86   : > { %v1264_v5 = vadd.f32 -128.0, %v386_v61  ;;  %v1265_v6 = vadd.f32 -128.0, %v387_v62 }
  0x88   : > { %1493 = vrot.lane.b32.xlu0 %v1492_v60, %s1705_s16  ;;  %v731_v60 = vld [vmem:[#allocation6 + $0x18] sm:$0xff] }
  0xf6   : > { %v1489_v2 = vpop.permute.xlu0 %1488 }
  0xf7   : > { %v1491_v3 = vunpack.i.h.bf16 %v1489_v2  ;;  %v1490_v4 = vunpack.i.l.bf16 %v1489_v2 }
  0xf9   : > { %v431_v10 = vsel %vm430_vm0, %v1264_v5, %v1490_v4  ;;  %v432_v11 = vsel %vm430_vm0, %v1265_v6, %v1491_v3 }
  0xfa   : > { %v1494_v7 = vpop.permute.xlu0 %1493 }
  0xfb   : > { %v1496_v8 = vunpack.i.h.bf16 %v1494_v7  ;;  %v1495_v9 = vunpack.i.l.bf16 %v1494_v7 }
  0xfd   : > { %v434_v12 = vsel %vm433_vm2, %v431_v10, %v1495_v9  ;;  %v435_v13 = vsel %vm433_vm2, %v432_v11, %v1496_v8  ;;  %v732_v8 = vld [vmem:[#allocation6 + $0x20] sm:$0xff]  ;;  %v733_v10 = vld [vmem:[#allocation6 + $0x28] sm:$0xff] }
  0xfe   : > { %v1362_v14 = vpack.c.bf16 %v435_v13, %v434_v12 }
 0x100   : > { %1363 = vmatprep.subr.bf16.mxu0 %v1362_v14 }
 0x101   : > { %1365 = vmatpush3.bf16.msra.mxu0 %v1362_v14 }
 0x102   : > { %1373 = vmatprep.subr.bf16.mxu0 %v1366_v1 }
 0x104   : > { %1327 = vmatmul.mubr.msk.f32.vlgmr.msra.gmra.mrb[0].mxu0 %vm430_vm0, %v1973_v15 }
 0x105   : > { %1375 = vmatpush3.bf16.msra.mxu0 %v1366_v1 }
 0x1d7   : > { %v1328_v16 = vpop.f32.mrb[0].mxu0 }
 0x1d8   : > { %v508_v17 = vpop.f32.mrb[1].mxu0 }
 0x1d9   : > { %523 = vrot.lane.b32.xlu0 %v508_v17, %s1706_s28  ;;  %519 = vrot.lane.b32.xlu1 %v508_v17, %s1707_s19 }
 0x1da   : > { %1333 = vmatprep.mubr.msk.f32.mxu1 %vm430_vm0, %v508_v17 }
 0x1db   : > { %1334 = vmatmul.mubr.msk.f32.vlgmr.msra.gmra.mrb[0].mxu1 %vm430_vm0, %v1328_v16 }
 0x1dd   : > { %521 = vrot.lane.b32.xlu1 %v1328_v16, %s1707_s19 }
 0x1e1   : > { %525 = vrot.lane.b32.xlu1 %v1328_v16, %s1706_s28 }
 0x24b   : > { %v520_v18 = vpop.permute.xlu1 %519  ;;  %v524_v20 = vpop.permute.xlu0 %523 }
 0x24c   : > { %1336 = vmatprep.mubr.msk.f32.mxu1 %vm430_vm0, %v520_v18 }
 0x24f   : > { %v522_v19 = vpop.permute.xlu1 %521 }
 0x250   : > { %1337 = vmatmul.mubr.msk.f32.gmra.mrb[2].mxu1 %vm430_vm0, %v522_v19 }
 0x251   : > { %1339 = vmatprep.mubr.msk.f32.mxu1 %vm430_vm0, %v524_v20 }
 0x253   : > { %v526_v21 = vpop.permute.xlu1 %525 }
 0x254   : > { %1340 = vmatmul.mubr.msk.f32.gmra.mrb[4].mxu1 %vm430_vm0, %v526_v21 }
 0x2ae   : > { %v1335_v24 = vpop.f32.mrb[0].mxu1 }
 0x2af   : > { %v647_v25 = vmul.f32 %v1335_v24, %v641_v22  ;;  %v611_v26 = vpop.f32.mrb[1].mxu1 }
 0x2b0   : > { %v646_v27 = vmul.f32 %v640_v23, %v611_v26 }
 0x2b1   : > { %v1384_v28 = vround.rtne.f32 %v647_v25 }
 0x2b2   : > { %v1383_v31 = vround.rtne.f32 %v646_v27 }
 0x2b3   : > { %v659_v32 = vand.u32 2147483647, %v1384_v28  ;;  %v735_v36 = vmul.f32 %v1384_v28, %v729_v30 }
 0x2b4   : > { %v658_v33 = vand.u32 2147483647, %v1383_v31  ;;  %v734_v34 = vmul.f32 %v1383_v31, %v728_v29 }
 0x2b5   : > { %v671_v35 = vshra.s32 %v659_v32, 23  ;;  %vm689_vm3 = vcmp.gt.f32.partialorder %v659_v32, 0.0 }
 0x2b6   : > { %v670_v37 = vshra.s32 %v658_v33, 23  ;;  %1346 = vmatprep.mubr.msk.f32.mxu0 %vm430_vm0, %v734_v34  ;;  %vm688_vm4 = vcmp.gt.f32.partialorder %v658_v33, 0.0 }
 0x2b7   : > { %v1277_v38 = vadd.s32 4294967170, %v671_v35  ;;  %1347 = vmatmul.mubr.msk.f32.vlgmr.msra.gmra.mrb[2].mxu0 %vm430_vm0, %v735_v36 }
 0x2b8   : > { %v1276_v39 = vadd.s32 4294967170, %v670_v37 }
 0x2b9   : > { %v683_v40 = vcvt.s32.f32 %v1277_v38 }
 0x2ba   : > { %v682_v41 = vcvt.s32.f32 %v1276_v39 }
 0x2bb   : > { %v695_v42 = vadd.f32 4.0, %v683_v40 }
 0x2bc   : > { %v694_v43 = vadd.f32 4.0, %v682_v41 }
 0x2bd   : > { %v701_v44 = vsel %vm689_vm3, %v695_v42, 0.0 }
 0x2be   : > { %v707_v45 = vsel %vm430_vm0, %v701_v44, 0.0  ;;  %v700_v46 = vsel %vm688_vm4, %v694_v43, 0.0 }
 0x2bf   : > { %v706_v47 = vsel %vm430_vm0, %v700_v46, 0.0 }
 0x2c0   : > { %v708_v48 = vadd.f32 %v707_v45, %v706_v47 }
 0x323   : > { %v1338_v51 = vpop.f32.mrb[2].mxu1 }
 0x324   : > { %v649_v52 = vmul.f32 %v1338_v51, %v643_v49  ;;  %v621_v53 = vpop.f32.mrb[3].mxu1 }
 0x325   : > { %v648_v54 = vmul.f32 %v642_v50, %v621_v53 }
 0x326   : > { %v1386_v57 = vround.rtne.f32 %v649_v52 }
 0x327   : > { %v1385_v61 = vround.rtne.f32 %v648_v54  ;;  %v1341_v62 = vpop.f32.mrb[4].mxu1 }
 0x328   : > { %v661_v63 = vand.u32 2147483647, %v1386_v57  ;;  %v651_v0 = vmul.f32 %v1341_v62, %v645_v55  ;;  %v631_v1 = vpop.f32.mrb[5].mxu1  ;;  %v737_v6 = vmul.f32 %v1386_v57, %v731_v60 }
 0x329   : > { %v660_v2 = vand.u32 2147483647, %v1385_v61  ;;  %v736_v3 = vmul.f32 %v1385_v61, %v730_v58  ;;  %v650_v4 = vmul.f32 %v644_v59, %v631_v1 }
 0x32a   : > { %v673_v5 = vshra.s32 %v661_v63, 23  ;;  %v1388_v7 = vround.rtne.f32 %v651_v0  ;;  %vm691_vm5 = vcmp.gt.f32.partialorder %v661_v63, 0.0 }
 0x32b   : > { %v672_v9 = vshra.s32 %v660_v2, 23  ;;  %v1387_v11 = vround.rtne.f32 %v650_v4  ;;  %1349 = vmatprep.mubr.msk.f32.mxu0 %vm430_vm0, %v736_v3  ;;  %vm690_vm6 = vcmp.gt.f32.partialorder %v660_v2, 0.0 }
 0x32c   : > { %v1279_v12 = vadd.s32 4294967170, %v673_v5  ;;  %v663_v13 = vand.u32 2147483647, %v1388_v7  ;;  %1350 = vmatmul.mubr.msk.f32.gmra.mrb[4].mxu0 %vm430_vm0, %v737_v6  ;;  %v739_v20 = vmul.f32 %v1388_v7, %v733_v10 }
 0x32d   : > { %v1278_v14 = vadd.s32 4294967170, %v672_v9  ;;  %v662_v16 = vand.u32 2147483647, %v1387_v11  ;;  %v738_v17 = vmul.f32 %v1387_v11, %v732_v8 }
 0x32e   : > { %v685_v18 = vcvt.s32.f32 %v1279_v12  ;;  %v675_v19 = vshra.s32 %v663_v13, 23  ;;  %vm693_vm8 = vcmp.gt.f32.partialorder %v663_v13, 0.0 }
 0x32f   : > { %v684_v21 = vcvt.s32.f32 %v1278_v14  ;;  %v674_v22 = vshra.s32 %v662_v16, 23  ;;  %1352 = vmatprep.mubr.msk.f32.mxu0 %vm430_vm0, %v738_v17  ;;  %vm692_vm7 = vcmp.gt.f32.partialorder %v662_v16, 0.0 }
 0x330   : > { %v697_v23 = vadd.f32 4.0, %v685_v18  ;;  %v1281_v24 = vadd.s32 4294967170, %v675_v19  ;;  %1353 = vmatmul.mubr.msk.f32.gmra.mrb[6].mxu0 %vm430_vm0, %v739_v20 }
 0x331   : > { %v696_v25 = vadd.f32 4.0, %v684_v21  ;;  %v1280_v26 = vadd.s32 4294967170, %v674_v22 }
 0x332   : > { %v687_v27 = vcvt.s32.f32 %v1281_v24  ;;  %v703_v28 = vsel %vm691_vm5, %v697_v23, 0.0 }
 0x333   : > { %v702_v29 = vsel %vm690_vm6, %v696_v25, 0.0  ;;  %v686_v30 = vcvt.s32.f32 %v1280_v26  ;;  %v711_v35 = vsel %vm430_vm0, %v703_v28, 0.0 }
 0x334   : > { %v709_v31 = vsel %vm430_vm0, %v702_v29, 0.0  ;;  %v699_v32 = vadd.f32 4.0, %v687_v27 }
 0x335   : > { %v698_v33 = vadd.f32 4.0, %v686_v30  ;;  %v710_v34 = vadd.f32 %v709_v31, %v708_v48 }
 0x336   : > { %v705_v37 = vsel %vm693_vm8, %v699_v32, 0.0 }
 0x337   : > { %v704_v36 = vsel %vm692_vm7, %v698_v33, 0.0  ;;  %v712_v38 = vadd.f32 %v711_v35, %v710_v34  ;;  %v715_v41 = vsel %vm430_vm0, %v705_v37, 0.0 }
 0x338   : > { %v713_v39 = vsel %vm430_vm0, %v704_v36, 0.0 }
 0x339   : > { %v714_v40 = vadd.f32 %v713_v39, %v712_v38 }
 0x33b   : > { %v716_v42 = vadd.f32 %v715_v41, %v714_v40 }
 0x38a   : > { %v1348_v43 = vpop.f32.mrb[2].mxu0 }
 0x38b   : > { %v824_v44 = vpop.f32.mrb[3].mxu0 }
 0x3ff   : > { %v1351_v45 = vpop.f32.mrb[4].mxu0 }
 0x400   : > { %v834_v46 = vpop.f32.mrb[5].mxu0 }
 0x401   : > { %v1497_v47 = vpack.i.bf16 %v1351_v45, %v834_v46 }
 0x403   : > { %1498 = vrot.lane.b32.xlu0 %v1497_v47, %s1704_s9  ;;  %v1354_v48 = vpop.f32.mrb[6].mxu0 }
 0x404   : > { %v844_v49 = vpop.f32.mrb[7].mxu0 }
 0x405   : > { %v1502_v50 = vpack.i.bf16 %v1354_v48, %v844_v49 }
 0x407   : > { %1503 = vrot.lane.b32.xlu1 %v1502_v50, %s1705_s16  ;;  %s1593_s16 = scalar_lea.vmem %s1108_s18, 16 }
 0x408   : > { %p1594_p7 = scmp.ne.s32.totalorder %s1108_s18, %s1593_s16 }
 0x40a   : > { %p1595_p2 = pnand %p1594_p7, %p1877_p11 }
 0x40c   : > { %p1596_p6 = pneg %p1595_p2 }
 0x421   : > { %873 = vxpose.xlu0.b32.start [1/2] (short) (narrow) %v1952_v56, 16 }
 0x425   : > { %874 = vxpose.xlu0.b32.end [2/2] (short) (narrow) %v1973_v15, 16 }
 0x42b   : > { %717 = vadd.xlane.f32.xlu1 %v716_v42 }
 0x475   : > { %v1499_v51 = vpop.permute.xlu0 %1498 }
 0x476   : > { %v1501_v52 = vunpack.i.h.bf16 %v1499_v51  ;;  %v1500_v53 = vunpack.i.l.bf16 %v1499_v51 }
 0x478   : > { %v870_v58 = vsel %vm430_vm0, %v1348_v43, %v1501_v52  ;;  %v869_v59 = vsel %vm430_vm0, %v824_v44, %v1500_v53 }
 0x479   : > { %v1504_v54 = vpop.permute.xlu1 %1503 }
 0x47a   : > { %v1506_v55 = vunpack.i.h.bf16 %v1504_v54  ;;  %v1505_v57 = vunpack.i.l.bf16 %v1504_v54 }
 0x47c   : > { %v871_v60 = vsel %vm433_vm2, %v869_v59, %v1505_v57  ;;  %v872_v61 = vsel %vm433_vm2, %v870_v58, %v1506_v55 }
 0x47d   : > { %v1376_v62 = vpack.c.bf16 %v872_v61, %v871_v60 }
 0x47f   : > { %1377 = vmatprep.subr.bf16.mxu0 %v1376_v62 }
 0x480   : > { %1379 = vmatpush3.bf16.msra.mxu0 %v1376_v62 }
 0x4a1   : > { %v889_v56 = vpop.trf.xlu0 }
 0x4a2   : > { %1359 = vmatprep.mubr.msk.f32.mxu0 %vm430_vm0, %v889_v56 }
 0x4a5   : > { %v890_v15 = vpop.trf.xlu0 }
 0x4a6   : > { %1360 = vmatmul.mubr.msk.f32.vlgmr.msra.gmra.mrb[8].mxu0 %vm430_vm0, %v890_v15 }
 0x4b8   : > { %v718_v63 = vpop.xlane.xlu1 %717 }
 0x4b9   : > { %v719_v0 = vrot.slane %v718_v63, 4 }
 0x4bb   : > { %v720_v1 = vadd.f32 %v719_v0, %v718_v63 }
 0x4bd   : > { %v721_v2 = vrot.slane %v720_v1, 2 }
 0x4bf   : > { %v722_v3 = vadd.f32 %v721_v2, %v720_v1 }
 0x4c1   : > { %v723_v4 = vrot.slane %v722_v3, 1 }
 0x4c3   : > { %v724_v5 = vadd.f32 %v723_v4, %v722_v3 }
 0x4c5   : > { %1389 = vpush %v724_v5 }
 0x4f6   : > { %s1390_s29 = spop %1389 }
 0x4f7   : > { %727 = sst [smem:[%s2010_s7]] %s1390_s29 }
 0x579   : > { %v1361_v6 = vpop.f32.mrb[8].mxu0 }
 0x57a   : > { %v977_v7 = vpop.f32.mrb[9].mxu0  ;;  %v1001_v8 = vmul.f32 0.344136, %v1361_v6  ;;  %v989_v10 = vmul.f32 1.402, %v1361_v6 }
 0x57b   : > { %v1000_v9 = vmul.f32 0.344136, %v977_v7  ;;  %v1013_v11 = vmul.f32 0.714136, %v1361_v6  ;;  %v988_v12 = vmul.f32 1.402, %v977_v7 }
 0x57c   : > { %1006 = vrot.lane.b32.xlu1 %v1001_v8, %s1707_s19  ;;  %v1012_v13 = vmul.f32 0.714136, %v977_v7  ;;  %v1024_v14 = vmul.f32 1.772, %v977_v7  ;;  %v1025_v16 = vmul.f32 1.772, %v1361_v6 }
 0x57d   : > { %1004 = vrot.lane.b32.xlu0 %v1000_v9, %s1707_s19 }
 0x580   : > { %994 = vrot.lane.b32.xlu1 %v989_v10, %s1706_s28 }
 0x584   : > { %1018 = vrot.lane.b32.xlu1 %v1013_v11, %s1706_s28 }
 0x588   : > { %992 = vrot.lane.b32.xlu1 %v988_v12, %s1706_s28 }
 0x58c   : > { %1016 = vrot.lane.b32.xlu1 %v1012_v13, %s1706_s28  ;;  %s1597_s28 = sshll.u32 %s2118_s6, 4  ;;  %s1598_s28 = int_to_ptr.vmem [resolvable:$false] %s1597_s28 }
 0x58d   : > { %s1599_s20 = scalar_lea.vmem %s1598_s28, 32  ;;  %p1600_p8 = scmp.lt.s32.totalorder %s1108_s18, %s1598_s28 }
 0x58e   : > { %p1601_p13 = scmp.lt.s32.totalorder %s1599_s20, %s1593_s16 }
 0x590   : > { %1028 = vrot.lane.b32.xlu1 %v1024_v14, %s1707_s19  ;;  %p1602_p0 = por %p1601_p13, %p1600_p8 }
 0x592   : > { %p1603_p5 = pnand %p1602_p0, %p1596_p6 }
 0x594   : > { %1030 = vrot.lane.b32.xlu1 %v1025_v16, %s1707_s19 }
 0x595   : > { %1606 = shalt.err (!%p1603_p5)
}
 0x596   : > { %1409 = dma.smem_to_vmem (%p1877_p11), %s2010_s7, 16, %s1108_s18, %s1074_s15   ;;  %v987_v18 = vadd.f32 128.0, %v1361_v6  ;;  %v986_v26 = vadd.f32 128.0, %v977_v7 }
 0x597   : > { %s2036_s19 = scalar_lea.vmem [#allocation9], %s1382_s8  ;;  %s1397_s29 = smul.u32 768, %s1689_s24 }
 0x598   : > { %s1090_s8 = sshll.u32 %s2036_s19, 4  ;;  %s1069_s30 = scalar_lea.sflag [#allocation4], %s1935_s11  ;;  %s2048_s8 = int_to_ptr.vmem [resolvable:$true] %s1090_s8 }
 0x599   : > { %s2055_s10 = scalar_lea.hbm %s2117_s5, %s1397_s29  ;;  %s1607_s18 = scalar_lea.vmem %s2048_s8, 768 }
 0x59a   : > { %p1608_p9 = scmp.ne.s32.totalorder %s2048_s8, %s1607_s18  ;;  %s1708_s24 = smov [#allocation9]  }
 0x59b   : > { %s1611_s15 = sshll.u32 %s1708_s24, 4  ;;  %s1612_s15 = int_to_ptr.vmem [resolvable:$false] %s1611_s15 }
 0x59c   : > { %p1609_p12 = pnand %p1608_p9, %p1877_p11  ;;  %s1613_s16 = scalar_lea.vmem %s1612_s15, 1536 }
 0x59d   : > { %p1614_p3 = scmp.lt.s32.totalorder %s2048_s8, %s1612_s15  ;;  %p1615_p4 = scmp.lt.s32.totalorder %s1613_s16, %s1607_s18 }
 0x59e   : > { %p1610_p1 = pneg %p1609_p12 }
 0x59f   : > { %p1616_p10 = por %p1615_p4, %p1614_p3 }
 0x5a1   : > { %p1617_p7 = pnand %p1616_p10, %p1610_p1 }
 0x5ee   : > { %v1007_v17 = vpop.permute.xlu1 %1006 }
 0x5ef   : > { %v1011_v21 = vsub.f32 %v987_v18, %v1007_v17  ;;  %v1005_v29 = vpop.permute.xlu0 %1004 }
 0x5f0   : > { %v1010_v34 = vsub.f32 %v986_v26, %v1005_v29 }
 0x5f2   : > { %v995_v19 = vpop.permute.xlu1 %994 }
 0x5f3   : > { %v999_v20 = vadd.f32 %v995_v19, %v987_v18 }
 0x5f5   : > { %v1392_v22 = vround.rtne.f32 %v999_v20 }
 0x5f6   : > { %v1019_v23 = vpop.permute.xlu1 %1018 }
 0x5f7   : > { %v1039_v24 = vmax.f32 %v1392_v22, 0.0  ;;  %v1023_v25 = vsub.f32 %v1011_v21, %v1019_v23 }
 0x5f9   : > { %v1041_v27 = vmin.f32 %v1039_v24, 255.0  ;;  %v1394_v28 = vround.rtne.f32 %v1023_v25 }
 0x5fa   : > { %v993_v30 = vpop.permute.xlu1 %992 }
 0x5fb   : > { %v1043_v31 = vmul.f32 0.003921569, %v1041_v27  ;;  %v1049_v32 = vmax.f32 %v1394_v28, 0.0  ;;  %v998_v33 = vadd.f32 %v993_v30, %v986_v26 }
 0x5fd   : > { %1045 = vst.msk [vmem:[%s2036_s19 + $0x8] sm:$0xff] %vm430_vm0, %v1043_v31  ;;  %v1051_v35 = vmin.f32 %v1049_v32, 255.0  ;;  %v1391_v36 = vround.rtne.f32 %v998_v33 }
 0x5fe   : > { %v1017_v37 = vpop.permute.xlu1 %1016 }
 0x5ff   : > { %v1053_v38 = vmul.f32 0.003921569, %v1051_v35  ;;  %v1038_v39 = vmax.f32 %v1391_v36, 0.0  ;;  %v1022_v40 = vsub.f32 %v1010_v34, %v1017_v37 }
 0x601   : > { %1291 = vst.msk [vmem:[%s2036_s19 + $0x18] sm:$0xff] %vm430_vm0, %v1053_v38  ;;  %v1040_v41 = vmin.f32 %v1038_v39, 255.0  ;;  %v1393_v42 = vround.rtne.f32 %v1022_v40 }
 0x602   : > { %v1029_v43 = vpop.permute.xlu1 %1028 }
 0x603   : > { %v1042_v44 = vmul.f32 0.003921569, %v1040_v41  ;;  %v1048_v45 = vmax.f32 %v1393_v42, 0.0  ;;  %v1034_v46 = vadd.f32 %v1029_v43, %v986_v26 }
 0x605   : > { %1044 = vst.msk [vmem:[%s2036_s19] sm:$0xff] %vm430_vm0, %v1042_v44  ;;  %v1050_v47 = vmin.f32 %v1048_v45, 255.0  ;;  %v1395_v48 = vround.rtne.f32 %v1034_v46 }
 0x606   : > { %v1031_v49 = vpop.permute.xlu1 %1030 }
 0x607   : > { %v1052_v50 = vmul.f32 0.003921569, %v1050_v47  ;;  %v1059_v51 = vmax.f32 %v1395_v48, 0.0  ;;  %v1035_v52 = vadd.f32 %v1031_v49, %v987_v18 }
 0x609   : > { %1290 = vst.msk [vmem:[%s2036_s19 + $0x10] sm:$0xff] %vm430_vm0, %v1052_v50  ;;  %v1061_v53 = vmin.f32 %v1059_v51, 255.0  ;;  %v1396_v54 = vround.rtne.f32 %v1035_v52 }
 0x60b   : > { %v1063_v55 = vmul.f32 0.003921569, %v1061_v53  ;;  %v1060_v57 = vmax.f32 %v1396_v54, 0.0 }
 0x60d   : > { %1292 = vst.msk [vmem:[%s2036_s19 + $0x20] sm:$0xff] %vm430_vm0, %v1063_v55  ;;  %v1062_v58 = vmin.f32 %v1060_v57, 255.0 }
 0x60f   : > { %v1064_v59 = vmul.f32 0.003921569, %v1062_v58 }
 0x611   : > { %1293 = vst.msk [vmem:[%s2036_s19 + $0x28] sm:$0xff] %vm430_vm0, %v1064_v59 }
 0x612   : > { %1620 = shalt.err (!%p1617_p7)
}
 0x613   : > { %s1621_s14 = scalar_lea.hbm %s2055_s10, 768  ;;  %s1625_s20 = scalar_lea.hbm %s2117_s5, 1536 }
 0x614   : > { %p1622_p2 = scmp.ne.s32.totalorder %s2055_s10, %s1621_s14  ;;  %p1626_p13 = scmp.lt.u32.totalorder %s2055_s10, %s2117_s5 }
 0x615   : > { %p1627_p0 = scmp.lt.u32.totalorder %s1625_s20, %s1621_s14  ;;  %p1629_p9 = scmp.lt.u32.totalorder %s1621_s14, %s2055_s10 }
 0x616   : > { %p1623_p6 = pnand %p1622_p2, %p1877_p11 }
 0x617   : > { %p1628_p5 = por %p1627_p0, %p1626_p13 }
 0x618   : > { %p1624_p8 = pneg %p1623_p6 }
 0x619   : > { %p1630_p12 = por %p1629_p9, %p1628_p5 }
 0x61b   : > { %p1631_p1 = pnand %p1630_p12, %p1624_p8 }
 0x61d   : > { %1634 = shalt.err (!%p1631_p1)
}
 0x61e   : > { %s1709_s7 = smov 128   ;;  %s1710_s9 = smov 8  }
 0x61f   : > { %1408 = dma.vmem_to_hbm [thread:$0]  (%p1877_p11), %s2048_s8, 768, %s2055_s10, %s1069_s30, %s1709_s7, %s1709_s7, %s1710_s9  }
 0x620 PF: > { %p2144_p3 = scmp.lt.s32.totalorder %s1697_s26, 2 }
 0x621   : > { %s2145_s18 = sld [smem:[#allocation15_spill]] (!%p2144_p3)  ;;  %s1119_s24 = sand.u32 (!%p2144_p3), 1, %s1677_s21  }
 0x622   : > { %1114 = sbr.rel (%p2144_p3) target bundleno = 1582 (0x62e), region = 64  ;;  %s1120_s15 = scalar_lea.sflag (!%p2144_p3), [#allocation4], %s1119_s24 }
 0x627   : > { %p2146_p4 = scmp.ne.s32.totalorder (!%p2144_p3), %s2145_s18, 0 }
 0x629   : > { %1668 = dma.done.wait (%p2146_p4), %s1120_s15, 768  }
 0x62a   : > { %1670 = vsyncadd (%p2146_p4), %s1120_s15, 4294966528  ;;  %s1129_s16 = scalar_lea.sflag [#allocation5], %s1119_s24 }
 0x62b   : > { %1672 = dma.done.wait (%p2146_p4), %s1129_s16, 16  }
 0x62c   : > { %1674 = vsyncadd (%p2146_p4), %s1129_s16, 4294967280 }
 0x62d   : > { %1134 = sfence }
 0x62e PF: > { %s27_s26 = sadd.s32 1, %s1697_s26   ;;  %s2147_s21 = smov %s1681_s22 }
 0x62f   : > { %p24_p11 = scmp.ge.s32.totalorder %s27_s26, 4   ;;  %s2148_s22 = smov %s1685_s23 }
 0x630   : > { %s2149_s23 = smov %s1891_s27  ;;  %s2150_s24 = smov %s1693_s25 }
 0x631   : > { %s2151_s25 = smov %s2153_s12  ;;  %26 = sbr.rel (!%p24_p11) target bundleno = 9 (0x9), region = 115 }
 0x638   :  { %1135 = vsyncpa [#allocation3], 1 }
 0x639   :  { %1137 = vsyncpa [#allocation3 + $0x1], 1 }
 0x63a   :  { %1138 = vsyncpa [#allocation7], 1 }
 0x63b   :  { %1139 = vsyncpa [#allocation4], 1 }
 0x63c   :  { %1141 = vsyncpa [#allocation4 + $0x1], 1 }
 0x63d   :  { %1142 = vsyncpa [#allocation5], 1 }
 0x63e   :  { %1144 = vsyncpa [#allocation5 + $0x1], 1 }

</bundles_post_ra>
